<compile_context>
chip_gen: v7x
topology: tpu7x:2x2x1
jax: 0.10.0
libtpu: 0.0.40
codegen_flags: <defaults>
</compile_context>

<pallas_src>
import functools

import jax
import jax.numpy as jnp
from jax.experimental import pallas as pl
from jax.experimental.pallas import tpu as pltpu


def _round_up(n, m):
    return ((n + m - 1) // m) * m


def _cdiv(a, b):
    return -(-a // b)


# -----------------------------------------------------------------------------
# Kernel: out = ((relu(relu(relu(x@W1+b1)@W2+b2)@W3+b3))@W4 + b4
# x arrives fp32 and is cast to bf16 in-kernel; dots accumulate in fp32 on the MXU.
# -----------------------------------------------------------------------------
def dqn_kernel(x_ref, w1_ref, b1_ref, w2_ref, b2_ref, w3_ref, b3_ref,
               w4_ref, b4_ref, out_ref):
    h = x_ref[...].astype(w1_ref.dtype)                      # fused fp32 -> bf16 cast
    # Linear(input_dim, 512) + ReLU
    h = jnp.dot(h, w1_ref[...], preferred_element_type=jnp.float32)
    h = jnp.maximum(h + b1_ref[...], 0.0).astype(w2_ref.dtype)
    # Linear(512, 256) + ReLU
    h = jnp.dot(h, w2_ref[...], preferred_element_type=jnp.float32)
    h = jnp.maximum(h + b2_ref[...], 0.0).astype(w3_ref.dtype)
    # Linear(256, 128) + ReLU
    h = jnp.dot(h, w3_ref[...], preferred_element_type=jnp.float32)
    h = jnp.maximum(h + b3_ref[...], 0.0).astype(w4_ref.dtype)
    # Linear(128, output_dim_padded)  (no activation)
    h = jnp.dot(h, w4_ref[...], preferred_element_type=jnp.float32)
    out_ref[...] = (h + b4_ref[...]).astype(out_ref.dtype)


# -----------------------------------------------------------------------------
# One-time parameter preparation (hoisted out of the per-call forward).
# Weights are stored transposed vs. PyTorch, i.e. W has shape [in, out] so the
# kernel computes y = x @ W + b.  Only the last layer's N dim is zero-padded to a
# multiple of 128 so the output store is lane-dense; biases stay fp32.
# -----------------------------------------------------------------------------
def prepare_params(params, compute_dtype=jnp.bfloat16):
    w1, b1, w2, b2, w3, b3, w4, b4 = params
    output_dim = w4.shape[-1]
    n_pad = _round_up(output_dim, 128)
    w4 = jnp.pad(w4, ((0, 0), (0, n_pad - output_dim)))
    b4 = jnp.pad(b4, ((0, 0), (0, n_pad - output_dim)))
    ws = [w.astype(compute_dtype) for w in (w1, w2, w3, w4)]
    bs = [b.reshape(1, -1).astype(jnp.float32) for b in (b1, b2, b3, b4)]
    prepared = (ws[0], bs[0], ws[1], bs[1], ws[2], bs[2], ws[3], bs[3])
    return jax.tree_util.tree_map(jax.block_until_ready, prepared), output_dim


def _choose_tb(batch, block_batch):
    """Batch tile: multiple of 8 sublanes, capped at block_batch.  If the whole
    batch would otherwise be one grid step but there is enough work (>=128 rows),
    split into >=2 steps so v7x's two TensorCores both get a 'parallel' slice."""
    batch8 = _round_up(batch, 8)
    tb = min(block_batch, batch8)
    if batch8 >= 128 and _cdiv(batch8, tb) < 2:
        tb = _round_up(_cdiv(batch8, 2), 8)
    return tb


@functools.partial(jax.jit, static_argnames=("output_dim", "block_batch"))
def dqn_forward(x, prepared, *, output_dim, block_batch=512):
    """x: [batch, input_dim] float32.  prepared: output of prepare_params."""
    w1, b1, w2, b2, w3, b3, w4, b4 = prepared
    batch, input_dim = x.shape
    n_pad = w4.shape[-1]

    tb = _choose_tb(batch, block_batch)
    grid = (_cdiv(batch, tb),)

    weights = (w1, b1, w2, b2, w3, b3, w4, b4)
    resident = lambda a: pl.BlockSpec(a.shape, lambda i: (0,) * a.ndim)

    out = pl.pallas_call(
        dqn_kernel,
        out_shape=jax.ShapeDtypeStruct((batch, n_pad), jnp.float32),
        grid=grid,
        in_specs=[pl.BlockSpec((tb, input_dim), lambda i: (i, 0))]
                 + [resident(p) for p in weights],
        out_specs=pl.BlockSpec((tb, n_pad), lambda i: (i, 0)),
        compiler_params=pltpu.CompilerParams(
            dimension_semantics=("parallel",),
            # Only needed if the tile is pushed past ~512 rows (keeps the default
            # scoped-VMEM limit from capping aggressive tiles, esp. on v7x).
            vmem_limit_bytes=(32 * 1024 * 1024) if tb > 512 else None,
        ),
    )(x, *weights)

    return out[:, :output_dim]


# -----------------------------------------------------------------------------
# Synthetic init + references
# -----------------------------------------------------------------------------
def init_dqn_params(input_dim, output_dim, key):
    """Deterministic synthetic init mirroring nn.Linear shapes (stored transposed)."""
    dims = [input_dim, 512, 256, 128, output_dim]
    params = []
    for i in range(4):
        key, kw, kb = jax.random.split(key, 3)
        bound = 1.0 / jnp.sqrt(dims[i])
        w = jax.random.uniform(kw, (dims[i], dims[i + 1]), jnp.float32,
                               minval=-bound, maxval=bound)
        b = jax.random.uniform(kb, (1, dims[i + 1]), jnp.float32,
                               minval=-bound, maxval=bound)
        params += [w, b]
    return tuple(params)


def dqn_reference_bf16(x, params):
    """Matched reference: same bf16 operands / fp32 accumulation as the kernel."""
    w1, b1, w2, b2, w3, b3, w4, b4 = params
    cd = jnp.bfloat16
    h = x.astype(cd)
    for w, b in ((w1, b1), (w2, b2), (w3, b3)):
        h = jnp.dot(h, w.astype(cd), preferred_element_type=jnp.float32)
        h = jnp.maximum(h + b, 0.0).astype(cd)
    out = jnp.dot(h, w4.astype(cd), preferred_element_type=jnp.float32)
    return out + b4


def dqn_reference_fp32(x, params):
    w1, b1, w2, b2, w3, b3, w4, b4 = params
    h = jnp.maximum(x @ w1 + b1, 0.0)
    h = jnp.maximum(h @ w2 + b2, 0.0)
    h = jnp.maximum(h @ w3 + b3, 0.0)
    return h @ w4 + b4


if __name__ == "__main__":
    key = jax.random.PRNGKey(0)
    batch, input_dim, output_dim = 8, 32, 8

    key, kx = jax.random.split(key)
    x = jax.random.normal(kx, (batch, input_dim), jnp.float32)
    params = init_dqn_params(input_dim, output_dim, key)

    # One-time weight prep (pad last-layer N to 128, cast to bf16).
    prepared, out_dim = prepare_params(params)

    out = dqn_forward(x, prepared, output_dim=out_dim)
    out = jax.block_until_ready(out)
    assert out.shape == (batch, output_dim)

    # Exact-semantics check vs. matched bf16-operand / fp32-accumulate reference.
    ref_bf16 = dqn_reference_bf16(x, params)
    assert jnp.allclose(out, ref_bf16, atol=1e-3, rtol=1e-3)

    # Sanity check vs. the original fp32 module (loose tolerance for bf16 operands).
    ref_fp32 = dqn_reference_fp32(x, params)
    assert jnp.allclose(out, ref_fp32, atol=5e-2, rtol=5e-2)

    print("KERNEL_OK")
</pallas_src>

<mosaic_0001>
module attributes {stable_mosaic.version = 11 : i64} {
  func.func @dqn_kernel(%arg0: i32, %arg1: memref<8x32xf32, #tpu.memory_space<vmem>>, %arg2: memref<32x512xbf16, #tpu.memory_space<vmem>>, %arg3: memref<1x512xf32, #tpu.memory_space<vmem>>, %arg4: memref<512x256xbf16, #tpu.memory_space<vmem>>, %arg5: memref<1x256xf32, #tpu.memory_space<vmem>>, %arg6: memref<256x128xbf16, #tpu.memory_space<vmem>>, %arg7: memref<1x128xf32, #tpu.memory_space<vmem>>, %arg8: memref<128x128xbf16, #tpu.memory_space<vmem>>, %arg9: memref<1x128xf32, #tpu.memory_space<vmem>>, %arg10: memref<8x128xf32, #tpu.memory_space<vmem>>) attributes {dimension_semantics = [#tpu.dimension_semantics<parallel>], iteration_bounds = array<i64: 1>, scalar_prefetch = 0 : i64, scratch_operands = 0 : i64, tpu.core_type = #tpu.core_type<tc>, window_params = [{transform_indices = @transform_0, window_bounds = array<i64: 8, 32>}, {pipeline_mode = #tpu.pipeline_mode<synchronous>, transform_indices = @transform_1, window_bounds = array<i64: 32, 512>}, {pipeline_mode = #tpu.pipeline_mode<synchronous>, transform_indices = @transform_2, window_bounds = array<i64: 1, 512>}, {pipeline_mode = #tpu.pipeline_mode<synchronous>, transform_indices = @transform_3, window_bounds = array<i64: 512, 256>}, {pipeline_mode = #tpu.pipeline_mode<synchronous>, transform_indices = @transform_4, window_bounds = array<i64: 1, 256>}, {pipeline_mode = #tpu.pipeline_mode<synchronous>, transform_indices = @transform_5, window_bounds = array<i64: 256, 128>}, {pipeline_mode = #tpu.pipeline_mode<synchronous>, transform_indices = @transform_6, window_bounds = array<i64: 1, 128>}, {pipeline_mode = #tpu.pipeline_mode<synchronous>, transform_indices = @transform_7, window_bounds = array<i64: 128, 128>}, {pipeline_mode = #tpu.pipeline_mode<synchronous>, transform_indices = @transform_8, window_bounds = array<i64: 1, 128>}, {transform_indices = @transform_9, window_bounds = array<i64: 8, 128>}]} {
    %c0 = arith.constant 0 : index
    %c0_0 = arith.constant 0 : index
    %0 = vector.load %arg1[%c0, %c0_0] : memref<8x32xf32, #tpu.memory_space<vmem>>, vector<8x32xf32>
    %1 = arith.truncf %0 : vector<8x32xf32> to vector<8x32xbf16>
    %c0_1 = arith.constant 0 : index
    %c0_2 = arith.constant 0 : index
    %2 = vector.load %arg2[%c0_1, %c0_2] : memref<32x512xbf16, #tpu.memory_space<vmem>>, vector<32x512xbf16>
    %cst = arith.constant dense<0.000000e+00> : vector<8x512xf32>
    %3 = tpu.matmul %1, %2, %cst {dimension_numbers = #tpu.dot_dimension_numbers<[1], [0], [0], [1], [0, 0, 1, 1], [], []>} : vector<8x32xbf16>, vector<32x512xbf16>, vector<8x512xf32> -> vector<8x512xf32>
    %c0_3 = arith.constant 0 : index
    %c0_4 = arith.constant 0 : index
    %4 = vector.load %arg3[%c0_3, %c0_4] : memref<1x512xf32, #tpu.memory_space<vmem>>, vector<1x512xf32>
    %5 = vector.broadcast %4 : vector<1x512xf32> to vector<8x512xf32>
    %6 = arith.addf %3, %5 : vector<8x512xf32>
    %cst_5 = arith.constant 0.000000e+00 : f32
    %7 = vector.broadcast %cst_5 : f32 to vector<8x512xf32>
    %8 = arith.maximumf %6, %7 : vector<8x512xf32>
    %9 = arith.truncf %8 : vector<8x512xf32> to vector<8x512xbf16>
    %c0_6 = arith.constant 0 : index
    %c0_7 = arith.constant 0 : index
    %10 = vector.load %arg4[%c0_6, %c0_7] : memref<512x256xbf16, #tpu.memory_space<vmem>>, vector<512x256xbf16>
    %cst_8 = arith.constant dense<0.000000e+00> : vector<8x256xf32>
    %11 = tpu.matmul %9, %10, %cst_8 {dimension_numbers = #tpu.dot_dimension_numbers<[1], [0], [0], [1], [0, 0, 1, 1], [], []>} : vector<8x512xbf16>, vector<512x256xbf16>, vector<8x256xf32> -> vector<8x256xf32>
    %c0_9 = arith.constant 0 : index
    %c0_10 = arith.constant 0 : index
    %12 = vector.load %arg5[%c0_9, %c0_10] : memref<1x256xf32, #tpu.memory_space<vmem>>, vector<1x256xf32>
    %13 = vector.broadcast %12 : vector<1x256xf32> to vector<8x256xf32>
    %14 = arith.addf %11, %13 : vector<8x256xf32>
    %cst_11 = arith.constant 0.000000e+00 : f32
    %15 = vector.broadcast %cst_11 : f32 to vector<8x256xf32>
    %16 = arith.maximumf %14, %15 : vector<8x256xf32>
    %17 = arith.truncf %16 : vector<8x256xf32> to vector<8x256xbf16>
    %c0_12 = arith.constant 0 : index
    %c0_13 = arith.constant 0 : index
    %18 = vector.load %arg6[%c0_12, %c0_13] : memref<256x128xbf16, #tpu.memory_space<vmem>>, vector<256x128xbf16>
    %cst_14 = arith.constant dense<0.000000e+00> : vector<8x128xf32>
    %19 = tpu.matmul %17, %18, %cst_14 {dimension_numbers = #tpu.dot_dimension_numbers<[1], [0], [0], [1], [0, 0, 1, 1], [], []>} : vector<8x256xbf16>, vector<256x128xbf16>, vector<8x128xf32> -> vector<8x128xf32>
    %c0_15 = arith.constant 0 : index
    %c0_16 = arith.constant 0 : index
    %20 = vector.load %arg7[%c0_15, %c0_16] : memref<1x128xf32, #tpu.memory_space<vmem>>, vector<1x128xf32>
    %21 = vector.broadcast %20 : vector<1x128xf32> to vector<8x128xf32>
    %22 = arith.addf %19, %21 : vector<8x128xf32>
    %cst_17 = arith.constant 0.000000e+00 : f32
    %23 = vector.broadcast %cst_17 : f32 to vector<8x128xf32>
    %24 = arith.maximumf %22, %23 : vector<8x128xf32>
    %25 = arith.truncf %24 : vector<8x128xf32> to vector<8x128xbf16>
    %c0_18 = arith.constant 0 : index
    %c0_19 = arith.constant 0 : index
    %26 = vector.load %arg8[%c0_18, %c0_19] : memref<128x128xbf16, #tpu.memory_space<vmem>>, vector<128x128xbf16>
    %cst_20 = arith.constant dense<0.000000e+00> : vector<8x128xf32>
    %27 = tpu.matmul %25, %26, %cst_20 {dimension_numbers = #tpu.dot_dimension_numbers<[1], [0], [0], [1], [0, 0, 1, 1], [], []>} : vector<8x128xbf16>, vector<128x128xbf16>, vector<8x128xf32> -> vector<8x128xf32>
    %c0_21 = arith.constant 0 : index
    %c0_22 = arith.constant 0 : index
    %28 = vector.load %arg9[%c0_21, %c0_22] : memref<1x128xf32, #tpu.memory_space<vmem>>, vector<1x128xf32>
    %29 = vector.broadcast %28 : vector<1x128xf32> to vector<8x128xf32>
    %30 = arith.addf %27, %29 : vector<8x128xf32>
    %c0_23 = arith.constant 0 : index
    %c0_24 = arith.constant 0 : index
    %31 = vector.load %arg10[%c0_23, %c0_24] : memref<8x128xf32, #tpu.memory_space<vmem>>, vector<8x128xf32>
    tpu.vector_store %arg10[%c0_23, %c0_24], %30 {strides = array<i32>} : memref<8x128xf32, #tpu.memory_space<vmem>>, vector<8x128xf32>,
    return
  }
  func.func @transform_0(%arg0: i32) -> (i32, i32) {
    %c0_i32 = arith.constant 0 : i32
    %c0_i32_0 = arith.constant 0 : i32
    return %arg0, %c0_i32 : i32, i32
  }
  func.func @transform_1(%arg0: i32) -> (i32, i32) {
    %c0_i32 = arith.constant 0 : i32
    %c0_i32_0 = arith.constant 0 : i32
    %c0_i32_1 = arith.constant 0 : i32
    return %c0_i32, %c0_i32_0 : i32, i32
  }
  func.func @transform_2(%arg0: i32) -> (i32, i32) {
    %c0_i32 = arith.constant 0 : i32
    %c0_i32_0 = arith.constant 0 : i32
    %c0_i32_1 = arith.constant 0 : i32
    return %c0_i32, %c0_i32_0 : i32, i32
  }
  func.func @transform_3(%arg0: i32) -> (i32, i32) {
    %c0_i32 = arith.constant 0 : i32
    %c0_i32_0 = arith.constant 0 : i32
    %c0_i32_1 = arith.constant 0 : i32
    return %c0_i32, %c0_i32_0 : i32, i32
  }
  func.func @transform_4(%arg0: i32) -> (i32, i32) {
    %c0_i32 = arith.constant 0 : i32
    %c0_i32_0 = arith.constant 0 : i32
    %c0_i32_1 = arith.constant 0 : i32
    return %c0_i32, %c0_i32_0 : i32, i32
  }
  func.func @transform_5(%arg0: i32) -> (i32, i32) {
    %c0_i32 = arith.constant 0 : i32
    %c0_i32_0 = arith.constant 0 : i32
    %c0_i32_1 = arith.constant 0 : i32
    return %c0_i32, %c0_i32_0 : i32, i32
  }
  func.func @transform_6(%arg0: i32) -> (i32, i32) {
    %c0_i32 = arith.constant 0 : i32
    %c0_i32_0 = arith.constant 0 : i32
    %c0_i32_1 = arith.constant 0 : i32
    return %c0_i32, %c0_i32_0 : i32, i32
  }
  func.func @transform_7(%arg0: i32) -> (i32, i32) {
    %c0_i32 = arith.constant 0 : i32
    %c0_i32_0 = arith.constant 0 : i32
    %c0_i32_1 = arith.constant 0 : i32
    return %c0_i32, %c0_i32_0 : i32, i32
  }
  func.func @transform_8(%arg0: i32) -> (i32, i32) {
    %c0_i32 = arith.constant 0 : i32
    %c0_i32_0 = arith.constant 0 : i32
    %c0_i32_1 = arith.constant 0 : i32
    return %c0_i32, %c0_i32_0 : i32, i32
  }
  func.func @transform_9(%arg0: i32) -> (i32, i32) {
    %c0_i32 = arith.constant 0 : i32
    %c0_i32_0 = arith.constant 0 : i32
    return %arg0, %c0_i32 : i32, i32
  }
}

</mosaic_0001>

<bundles_post_ra>
// kernel: dqn_forward.1
= control target key start
LH: loop header
LB: loop body
LE: loop exit
PB: predicated region body
PF: predicated region fallthrough
CT: control target
= control target key end

     0   :  { %14 = vsyncpa [#allocation3], 0  ;;  %s1685_s0 = inlined_call_operand.hbm [shape: f32[8,32], index: 0, kind: input, shape index: {}]   ;;  %s1686_s1 = inlined_call_operand.hbm [shape: bf16[32,512], index: 1, kind: input, shape index: {}]   ;;  %s1687_s2 = inlined_call_operand.vmem [shape: f32[1,512], index: 2, kind: input, shape index: {}]   ;;  %s1688_s3 = inlined_call_operand.hbm [shape: bf16[512,256], index: 3, kind: input, shape index: {}]   ;;  %s1689_s4 = inlined_call_operand.vmem [shape: f32[1,256], index: 4, kind: input, shape index: {}]   ;;  %s1690_s5 = inlined_call_operand.hbm [shape: bf16[256,128], index: 5, kind: input, shape index: {}]   ;;  %s1691_s6 = inlined_call_operand.vmem [shape: f32[1,128], index: 6, kind: input, shape index: {}]   ;;  %s1692_s7 = inlined_call_operand.hbm [shape: bf16[128,128], index: 7, kind: input, shape index: {}]   ;;  %s1693_s8 = inlined_call_operand.vmem [shape: f32[1,128], index: 8, kind: input, shape index: {}]   ;;  %s1694_s9 = inlined_call_operand.hbm [shape: f32[8,128], index: 9, kind: output, shape index: {}]  }
   0x1   :  { %15 = vsyncpa [#allocation6], 0 }
   0x2   :  { %16 = vsyncpa [#allocation9], 0 }
   0x3   :  { %17 = vsyncpa [#allocation4], 0  ;;  %s1498_s30 = smov [#allocation5]   ;;  %s1358_s13 = scalar_lea.hbm %s1686_s1, 1024 }
   0x4   :  { %s33_s10 = sshll.u32 %s1498_s30, 4  ;;  %p1359_p0 = scmp.ne.s32.totalorder %s1686_s1, %s1358_s13  ;;  %s34_s10 = int_to_ptr.vmem [resolvable:$true] %s33_s10 }
   0x5   :  { %p1362_p1 = scmp.lt.u32.totalorder %s1358_s13, %s1686_s1 }
   0x7   :  { %p1364_p2 = pnand %p1362_p1, %p1359_p0 }
   0x9   :  { %1367 = shalt.err (!%p1364_p2)
}
   0xa   :  { %s1368_s18 = scalar_lea.vmem %s34_s10, 1024  ;;  %p1373_p4 = scmp.lt.s32.totalorder %s34_s10, %s34_s10 }
   0xb   :  { %p1369_p3 = scmp.ne.s32.totalorder %s34_s10, %s1368_s18  ;;  %p1374_p5 = scmp.lt.s32.totalorder %s1368_s18, %s1368_s18 }
   0xd   :  { %p1375_p6 = por %p1374_p5, %p1373_p4 }
   0xf   :  { %p1376_p7 = pnand %p1375_p6, %p1369_p3 }
  0x11   :  { %1379 = shalt.err (!%p1376_p7)
}
  0x12   :  { %s1499_s19 = smov 256   ;;  %s1500_s20 = smov 16  }
  0x13   :  { %39 = dma.hbm_to_vmem [thread:$0]  %s1686_s1, 1024, %s34_s10, [#allocation6], %s1499_s19, %s1499_s19, %s1500_s20  }
  0x14   :  { %s1501_s23 = smov [#allocation8]   ;;  %s1380_s27 = scalar_lea.hbm %s1690_s5, 2048 }
  0x15   :  { %s61_s24 = sshll.u32 %s1501_s23, 4  ;;  %p1381_p8 = scmp.ne.s32.totalorder %s1690_s5, %s1380_s27  ;;  %s62_s24 = int_to_ptr.vmem [resolvable:$true] %s61_s24 }
  0x16   :  { %p1384_p9 = scmp.lt.u32.totalorder %s1380_s27, %s1690_s5 }
  0x18   :  { %p1386_p10 = pnand %p1384_p9, %p1381_p8 }
  0x1a   :  { %1389 = shalt.err (!%p1386_p10)
}
  0x1b   :  { %s1390_s12 = scalar_lea.vmem %s62_s24, 2048  ;;  %p1395_p12 = scmp.lt.s32.totalorder %s62_s24, %s62_s24 }
  0x1c   :  { %p1391_p11 = scmp.ne.s32.totalorder %s62_s24, %s1390_s12  ;;  %p1396_p13 = scmp.lt.s32.totalorder %s1390_s12, %s1390_s12 }
  0x1e   :  { %p1397_p0 = por %p1396_p13, %p1395_p12 }
  0x20   :  { %p1398_p1 = pnand %p1397_p0, %p1391_p11 }
  0x22   :  { %1401 = shalt.err (!%p1398_p1)
}
  0x23   :  { %s1502_s1 = smov 64   ;;  %s1503_s10 = smov 4  }
  0x24   :  { %67 = dma.hbm_to_vmem [thread:$0]  %s1690_s5, 2048, %s62_s24, [#allocation9], %s1502_s1, %s1502_s1, %s1503_s10  }
  0x25   :  { %s1504_s15 = smov [#allocation2]   ;;  %s1505_s17 = smov [#allocation7]  }
  0x26   :  { %s24_s16 = sshll.u32 %s1504_s15, 4  ;;  %s47_s18 = sshll.u32 %s1505_s17, 4  ;;  %s25_s16 = int_to_ptr.vmem [resolvable:$true] %s24_s16  ;;  %s1590_s18 = int_to_ptr.vmem [resolvable:$true] %s47_s18 }
  0x27   :  { %s1402_s21 = scalar_lea.hbm %s1685_s0, 128 }
  0x28   :  { %p1403_p2 = scmp.ne.s32.totalorder %s1685_s0, %s1402_s21  ;;  %p1406_p3 = scmp.lt.u32.totalorder %s1402_s21, %s1685_s0 }
  0x2a   :  { %p1408_p4 = pnand %p1406_p3, %p1403_p2 }
  0x2c   :  { %1411 = shalt.err (!%p1408_p4)
}
  0x2d   :  { %s1412_s5 = scalar_lea.vmem %s25_s16, 128  ;;  %p1417_p6 = scmp.lt.s32.totalorder %s25_s16, %s25_s16 }
  0x2e   :  { %p1413_p5 = scmp.ne.s32.totalorder %s25_s16, %s1412_s5  ;;  %p1418_p7 = scmp.lt.s32.totalorder %s1412_s5, %s1412_s5 }
  0x30   :  { %p1419_p8 = por %p1418_p7, %p1417_p6 }
  0x32   :  { %p1420_p9 = pnand %p1419_p8, %p1413_p5 }
  0x34   :  { %1423 = shalt.err (!%p1420_p9)
}
  0x35   :  { %27 = dma.hbm_to_vmem [thread:$0]  %s1685_s0, 128, %s25_s16, [#allocation3]  }
  0x36   :  { %s1424_s30 = scalar_lea.hbm %s1688_s3, 8192 }
  0x37   :  { %p1425_p10 = scmp.ne.s32.totalorder %s1688_s3, %s1424_s30  ;;  %p1428_p11 = scmp.lt.u32.totalorder %s1424_s30, %s1688_s3 }
  0x39   :  { %p1430_p12 = pnand %p1428_p11, %p1425_p10 }
  0x3b   :  { %1433 = shalt.err (!%p1430_p12)
}
  0x3c   :  { %s1434_s15 = scalar_lea.vmem %s1590_s18, 8192  ;;  %p1439_p0 = scmp.lt.s32.totalorder %s1590_s18, %s1590_s18 }
  0x3d   :  { %p1435_p13 = scmp.ne.s32.totalorder %s1590_s18, %s1434_s15  ;;  %p1440_p1 = scmp.lt.s32.totalorder %s1434_s15, %s1434_s15 }
  0x3f   :  { %p1441_p2 = por %p1440_p1, %p1439_p0 }
  0x41   :  { %p1442_p3 = pnand %p1441_p2, %p1435_p13 }
  0x43   :  { %1445 = shalt.err (!%p1442_p3)
}
  0x44   :  { %s1506_s0 = smov 128   ;;  %s1507_s16 = smov 8  }
  0x45   :  { %53 = dma.hbm_to_vmem [thread:$0]  %s1688_s3, 8192, %s1590_s18, [#allocation6], %s1506_s0, %s1506_s0, %s1507_s16  }
  0x46   :  { %s1508_s20 = smov [#allocation10]   ;;  %s1446_s25 = scalar_lea.hbm %s1692_s7, 1024 }
  0x47   :  { %s75_s21 = sshll.u32 %s1508_s20, 4  ;;  %p1447_p4 = scmp.ne.s32.totalorder %s1692_s7, %s1446_s25  ;;  %s76_s21 = int_to_ptr.vmem [resolvable:$true] %s75_s21 }
  0x48   :  { %p1450_p5 = scmp.lt.u32.totalorder %s1446_s25, %s1692_s7 }
  0x4a   :  { %p1452_p6 = pnand %p1450_p5, %p1447_p4 }
  0x4c   :  { %1455 = shalt.err (!%p1452_p6)
}
  0x4d   :  { %s1456_s28 = scalar_lea.vmem %s76_s21, 1024  ;;  %p1461_p8 = scmp.lt.s32.totalorder %s76_s21, %s76_s21 }
  0x4e   :  { %p1457_p7 = scmp.ne.s32.totalorder %s76_s21, %s1456_s28  ;;  %p1462_p9 = scmp.lt.s32.totalorder %s1456_s28, %s1456_s28 }
  0x50   :  { %p1463_p10 = por %p1462_p9, %p1461_p8 }
  0x52   :  { %p1464_p11 = pnand %p1463_p10, %p1457_p7 }
  0x54   :  { %1467 = shalt.err (!%p1464_p11)
}
  0x55   :  { %81 = dma.hbm_to_vmem [thread:$0]  %s1692_s7, 1024, %s76_s21, [#allocation9], %s1502_s1, %s1502_s1, %s1503_s10  }
  0x56   :  { %1490 = dma.done.wait [#allocation3], 128  }
  0x57   :  { %1491 = vsyncadd [#allocation3], 4294967168 }
  0x58   :  { %1492 = dma.done.wait [#allocation6], 9216  }
  0x59   :  { %1493 = vsyncadd [#allocation6], 4294958080 }
  0x5a   :  { %1494 = dma.done.wait [#allocation9], 3072  }
  0x5b   :  { %1495 = vsyncadd [#allocation9], 4294964224  ;;  %v1509_v0 = vmov 0   ;;  %v1226_v1 = vld [vmem:[#allocation5 + $0x4] ss:$16 sps:$4 sm:$0xff]   ;;  %v100_v5 = vld [vmem:[#allocation2] sm:$0xff]  ;;  %v112_v56 = vlaneseq }
  0x5c   :  { %208 = vmatprep.mubr.bf16.mxu1 %v1509_v0  ;;  %v1228_v2 = vld [vmem:[#allocation5] ss:$16 sps:$4 sm:$0xff]   ;;  %176 = vmatprep.subr.bf16.mxu1 %v1226_v1  ;;  %v1229_v3 = vld [vmem:[#allocation5 + $0x24] ss:$16 sps:$4 sm:$0xff]   ;;  %v1234_v6 = vld [vmem:[#allocation5 + $0xc] ss:$16 sps:$4 sm:$0xff]   ;;  %v101_v8 = vpack.c.bf16 %v100_v5, %v100_v5 }
  0x5d   :  { %v1231_v4 = vld [vmem:[#allocation5 + $0x20] ss:$16 sps:$4 sm:$0xff]   ;;  %177 = vmatpush1.bf16.msra.mxu1 %v1228_v2  ;;  %v1232_v7 = vld [vmem:[#allocation5 + $0x8] ss:$16 sps:$4 sm:$0xff]   ;;  %v1238_v9 = vld [vmem:[#allocation7 + $0x4] ss:$8 sps:$4 sm:$0xff]  }
  0x5e   :  { %178 = vmatprep.subr.bf16.mxu1 %v1229_v3  ;;  %v1240_v10 = vld [vmem:[#allocation7] ss:$8 sps:$4 sm:$0xff]   ;;  %vm172_vm0 = vcmask 261120   ;;  %v1241_v11 = vld [vmem:[#allocation7 + $0x14] ss:$8 sps:$4 sm:$0xff]   ;;  %662 = vmatprep.subr.bf16.mxu0 %v1238_v9  ;;  %v1638_v57 = vshrl.u32 %v112_v56, 7 }
  0x5f   :  { %v1237_v12 = vld [vmem:[#allocation5 + $0x2c] ss:$16 sps:$4 sm:$0xff]   ;;  %663 = vmatpush1.bf16.msra.mxu0 %v1240_v10  ;;  %v1243_v13 = vld [vmem:[#allocation7 + $0x10] ss:$8 sps:$4 sm:$0xff]   ;;  %v1246_v16 = vld [vmem:[#allocation7 + $0x20] ss:$8 sps:$4 sm:$0xff]  }
  0x60   :  { %664 = vmatprep.subr.bf16.mxu0 %v1241_v11  ;;  %v1244_v14 = vld [vmem:[#allocation7 + $0x24] ss:$8 sps:$4 sm:$0xff]   ;;  %v1235_v15 = vld [vmem:[#allocation5 + $0x28] ss:$16 sps:$4 sm:$0xff]   ;;  %v1247_v17 = vld [vmem:[#allocation7 + $0x34] ss:$8 sps:$4 sm:$0xff]  }
  0x61   :  { %179 = vmatpush1.bf16.msra.mxu1 %v1231_v4  ;;  %v1249_v18 = vld [vmem:[#allocation7 + $0x30] ss:$8 sps:$4 sm:$0xff]   ;;  %v1250_v19 = vld [vmem:[#allocation7 + $0x44] ss:$8 sps:$4 sm:$0xff]   ;;  %v1252_v20 = vld [vmem:[#allocation7 + $0x40] ss:$8 sps:$4 sm:$0xff]  }
  0x62   :  { %217 = vmatprep.subr.bf16.mxu1 %v1234_v6  ;;  %v1253_v21 = vld [vmem:[#allocation7 + $0x54] ss:$8 sps:$4 sm:$0xff]   ;;  %v1255_v22 = vld [vmem:[#allocation7 + $0x50] ss:$8 sps:$4 sm:$0xff]   ;;  %v1256_v23 = vld [vmem:[#allocation7 + $0x64] ss:$8 sps:$4 sm:$0xff]  }
  0x63   :  { %665 = vmatpush1.bf16.msra.mxu0 %v1243_v13  ;;  %v1258_v24 = vld [vmem:[#allocation7 + $0x60] ss:$8 sps:$4 sm:$0xff]   ;;  %v1259_v25 = vld [vmem:[#allocation7 + $0x74] ss:$8 sps:$4 sm:$0xff]   ;;  %v1261_v26 = vld [vmem:[#allocation7 + $0x70] ss:$8 sps:$4 sm:$0xff]  }
  0x64   :  { %1062 = vmatmul.mubr.msk.bf16.vlgmr.msra.gmra.mrb[0].mxu1 %vm172_vm0, %v101_v8  ;;  %666 = vmatprep.subr.bf16.mxu0 %v1244_v14  ;;  %v1262_v27 = vld [vmem:[#allocation7 + $0x84] ss:$8 sps:$4 sm:$0xff]   ;;  %v1264_v28 = vld [vmem:[#allocation7 + $0x80] ss:$8 sps:$4 sm:$0xff]   ;;  %v1265_v29 = vld [vmem:[#allocation7 + $0x94] ss:$8 sps:$4 sm:$0xff]  }
  0x65   :  { %218 = vmatpush1.bf16.msra.mxu1 %v1232_v7  ;;  %249 = vmatprep.mubr.bf16.mxu1 %v1509_v0  ;;  %v1267_v30 = vld [vmem:[#allocation7 + $0x90] ss:$8 sps:$4 sm:$0xff]   ;;  %v1268_v31 = vld [vmem:[#allocation7 + $0xa4] ss:$8 sps:$4 sm:$0xff]   ;;  %v1270_v32 = vld [vmem:[#allocation7 + $0xa0] ss:$8 sps:$4 sm:$0xff]  }
  0x66   :  { %219 = vmatprep.subr.bf16.mxu1 %v1237_v12  ;;  %v1271_v33 = vld [vmem:[#allocation7 + $0xb4] ss:$8 sps:$4 sm:$0xff]   ;;  %v1273_v34 = vld [vmem:[#allocation7 + $0xb0] ss:$8 sps:$4 sm:$0xff]   ;;  %v1274_v35 = vld [vmem:[#allocation7 + $0xc4] ss:$8 sps:$4 sm:$0xff]  }
  0x67   :  { %667 = vmatpush1.bf16.msra.mxu0 %v1246_v16  ;;  %v1276_v36 = vld [vmem:[#allocation7 + $0xc0] ss:$8 sps:$4 sm:$0xff]   ;;  %v1277_v37 = vld [vmem:[#allocation7 + $0xd4] ss:$8 sps:$4 sm:$0xff]   ;;  %v1279_v38 = vld [vmem:[#allocation7 + $0xd0] ss:$8 sps:$4 sm:$0xff]  }
  0x68   :  { %668 = vmatprep.subr.bf16.mxu0 %v1247_v17  ;;  %v1280_v39 = vld [vmem:[#allocation7 + $0xe4] ss:$8 sps:$4 sm:$0xff]   ;;  %v1282_v40 = vld [vmem:[#allocation7 + $0xe0] ss:$8 sps:$4 sm:$0xff]   ;;  %v1283_v41 = vld [vmem:[#allocation7 + $0xf4] ss:$8 sps:$4 sm:$0xff]  }
  0x69   :  { %220 = vmatpush1.bf16.msra.mxu1 %v1235_v15  ;;  %v1285_v42 = vld [vmem:[#allocation7 + $0xf0] ss:$8 sps:$4 sm:$0xff]   ;;  %v1288_v43 = vld [vmem:[#allocation7 + $0x104] ss:$8 sps:$4 sm:$0xff]   ;;  %v114_v58 = vsub.s32 0, %v1638_v57  ;;  %v118_v60 = vsub.s32 1, %v1638_v57 }
  0x6a   :  { %v1334_v44 = vld [vmem:[#allocation8 + $0x40] sm:$0xff]   ;;  %v1336_v46 = vld [vmem:[#allocation8 + $0x48] sm:$0xff]   ;;  %v1338_v48 = vld [vmem:[#allocation8 + $0x50] sm:$0xff]   ;;  %v126_v4 = vsub.s32 3, %v1638_v57  ;;  %vm1511_vm1 = vmmov 0   ;;  %s1512_s12 = smov [#allocation11]  }
  0x6b   :  { %669 = vmatpush1.bf16.msra.mxu0 %v1249_v18  ;;  %v1335_v45 = vld [vmem:[#allocation8] sm:$0xff]   ;;  %1154 = vmatprep.subr.bf16.mxu1 %v1334_v44  ;;  %v1337_v47 = vld [vmem:[#allocation8 + $0x8] sm:$0xff]   ;;  %v1339_v49 = vld [vmem:[#allocation8 + $0x10] sm:$0xff]   ;;  %s1043_s13 = sshll.u32 %s1512_s12, 4  ;;  %s1044_s13 = int_to_ptr.vmem [resolvable:$true] %s1043_s13 }
  0x6c   :  { %1063 = vmatmul.mubr.msk.bf16.vlgmr.msra.gmra.mrb[4].mxu1 %vm172_vm0, %v101_v8  ;;  %670 = vmatprep.subr.bf16.mxu0 %v1250_v19  ;;  %v1340_v50 = vld [vmem:[#allocation8 + $0x58] sm:$0xff]   ;;  %v1342_v52 = vld [vmem:[#allocation8 + $0x60] sm:$0xff]   ;;  %v1344_v54 = vld [vmem:[#allocation8 + $0x68] sm:$0xff]   ;;  %p1473_p13 = scmp.lt.s32.totalorder %s1044_s13, %s1044_s13 }
  0x6d   :  { %1155 = vmatpush3.bf16.msra.mxu1 %v1335_v45  ;;  %v1341_v51 = vld [vmem:[#allocation8 + $0x18] sm:$0xff]   ;;  %v1343_v53 = vld [vmem:[#allocation8 + $0x20] sm:$0xff]   ;;  %v1345_v55 = vld [vmem:[#allocation8 + $0x28] sm:$0xff]  }
  0x6e   :  { %1156 = vmatprep.subr.bf16.mxu1 %v1336_v46  ;;  %v1644_v59 = vld [vmem:[%s1687_s2] sm:$0xf]  ;;  %v1286_v9 = vld [vmem:[#allocation7 + $0x100] ss:$8 sps:$4 sm:$0xff]   ;;  %v1291_v12 = vld [vmem:[#allocation7 + $0x114] ss:$8 sps:$4 sm:$0xff]  }
  0x6f   :  { %671 = vmatpush1.bf16.msra.mxu0 %v1252_v20  ;;  %v115_v61 = vrot.slane %v1644_v59, %v114_v58  ;;  %v119_v62 = vrot.slane %v1644_v59, %v118_v60  ;;  %v127_v10 = vrot.slane %v1644_v59, %v126_v4  ;;  %v1289_v15 = vld [vmem:[#allocation7 + $0x110] ss:$8 sps:$4 sm:$0xff]   ;;  %v1294_v18 = vld [vmem:[#allocation7 + $0x124] ss:$8 sps:$4 sm:$0xff]   ;;  %v1327_v44 = vld [vmem:[#allocation7 + $0x1d4] ss:$8 sps:$4 sm:$0xff]  }
  0x70   :  { %672 = vmatprep.subr.bf16.mxu0 %v1253_v21  ;;  %v1292_v21 = vld [vmem:[#allocation7 + $0x120] ss:$8 sps:$4 sm:$0xff]   ;;  %v1325_v45 = vld [vmem:[#allocation7 + $0x1d0] ss:$8 sps:$4 sm:$0xff]  }
  0x71   :  { %1157 = vmatpush3.bf16.msra.mxu1 %v1337_v47  ;;  %v1330_v47 = vld [vmem:[#allocation7 + $0x1e4] ss:$8 sps:$4 sm:$0xff]   ;;  %v1348_v56 = vld [vmem:[#allocation8 + $0x78] sm:$0xff]  }
  0x72   :  { %1158 = vmatprep.subr.bf16.mxu1 %v1338_v48  ;;  %v1328_v48 = vld [vmem:[#allocation7 + $0x1e0] ss:$8 sps:$4 sm:$0xff]  }
  0x73   :  { %673 = vmatpush1.bf16.msra.mxu0 %v1255_v22 }
  0x74   :  { %674 = vmatprep.subr.bf16.mxu0 %v1256_v23  ;;  %v1297_v23 = vld [vmem:[#allocation7 + $0x134] ss:$8 sps:$4 sm:$0xff]  }
  0x75   :  { %1159 = vmatpush3.bf16.msra.mxu1 %v1339_v49 }
  0x76   :  { %1160 = vmatprep.subr.bf16.mxu1 %v1340_v50  ;;  %v1333_v50 = vld [vmem:[#allocation7 + $0x1f4] ss:$8 sps:$4 sm:$0xff]  }
  0x77   :  { %675 = vmatpush1.bf16.msra.mxu0 %v1258_v24  ;;  %v1295_v24 = vld [vmem:[#allocation7 + $0x130] ss:$8 sps:$4 sm:$0xff]  }
  0x78   :  { %676 = vmatprep.subr.bf16.mxu0 %v1259_v25  ;;  %v1300_v25 = vld [vmem:[#allocation7 + $0x144] ss:$8 sps:$4 sm:$0xff]  }
  0x79   :  { %1161 = vmatpush3.bf16.msra.mxu1 %v1341_v51  ;;  %v1331_v51 = vld [vmem:[#allocation7 + $0x1f0] ss:$8 sps:$4 sm:$0xff]  }
  0x7a   :  { %1162 = vmatprep.subr.bf16.mxu1 %v1342_v52 }
  0x7b   :  { %677 = vmatpush1.bf16.msra.mxu0 %v1261_v26  ;;  %v1298_v26 = vld [vmem:[#allocation7 + $0x140] ss:$8 sps:$4 sm:$0xff]  }
  0x7c   :  { %678 = vmatprep.subr.bf16.mxu0 %v1262_v27  ;;  %v1303_v27 = vld [vmem:[#allocation7 + $0x154] ss:$8 sps:$4 sm:$0xff]  }
  0x7d   :  { %1163 = vmatpush3.bf16.msra.mxu1 %v1343_v53 }
  0x7e   :  { %1164 = vmatprep.subr.bf16.mxu1 %v1344_v54  ;;  %v1346_v54 = vld [vmem:[#allocation8 + $0x70] sm:$0xff]  }
  0x7f   :  { %679 = vmatpush1.bf16.msra.mxu0 %v1264_v28  ;;  %v1301_v28 = vld [vmem:[#allocation7 + $0x150] ss:$8 sps:$4 sm:$0xff]  }
  0x80   :  { %680 = vmatprep.subr.bf16.mxu0 %v1265_v29  ;;  %v1306_v29 = vld [vmem:[#allocation7 + $0x164] ss:$8 sps:$4 sm:$0xff]  }
  0x81   :  { %1165 = vmatpush3.bf16.msra.mxu1 %v1345_v55  ;;  %v1347_v55 = vld [vmem:[#allocation8 + $0x30] sm:$0xff]  }
  0x82   :  { %1166 = vmatprep.subr.bf16.mxu1 %v1346_v54 }
  0x83   :  { %681 = vmatpush1.bf16.msra.mxu0 %v1267_v30  ;;  %v1304_v30 = vld [vmem:[#allocation7 + $0x160] ss:$8 sps:$4 sm:$0xff]  }
  0x84   :  { %682 = vmatprep.subr.bf16.mxu0 %v1268_v31  ;;  %v1309_v31 = vld [vmem:[#allocation7 + $0x174] ss:$8 sps:$4 sm:$0xff]  }
  0x85   :  { %1167 = vmatpush3.bf16.msra.mxu1 %v1347_v55 }
  0x86   :  { %1168 = vmatprep.subr.bf16.mxu1 %v1348_v56 }
  0x87   :  { %683 = vmatpush1.bf16.msra.mxu0 %v1270_v32  ;;  %v1307_v32 = vld [vmem:[#allocation7 + $0x170] ss:$8 sps:$4 sm:$0xff]  }
  0x88   :  { %684 = vmatprep.subr.bf16.mxu0 %v1271_v33  ;;  %v1312_v33 = vld [vmem:[#allocation7 + $0x184] ss:$8 sps:$4 sm:$0xff]  }
  0x8b   :  { %685 = vmatpush1.bf16.msra.mxu0 %v1273_v34  ;;  %v1310_v34 = vld [vmem:[#allocation7 + $0x180] ss:$8 sps:$4 sm:$0xff]  }
  0x8c   :  { %686 = vmatprep.subr.bf16.mxu0 %v1274_v35  ;;  %v1315_v35 = vld [vmem:[#allocation7 + $0x194] ss:$8 sps:$4 sm:$0xff]  }
  0x8f   :  { %687 = vmatpush1.bf16.msra.mxu0 %v1276_v36  ;;  %v1313_v36 = vld [vmem:[#allocation7 + $0x190] ss:$8 sps:$4 sm:$0xff]  }
  0x90   :  { %688 = vmatprep.subr.bf16.mxu0 %v1277_v37  ;;  %v1318_v37 = vld [vmem:[#allocation7 + $0x1a4] ss:$8 sps:$4 sm:$0xff]  }
  0x93   :  { %689 = vmatpush1.bf16.msra.mxu0 %v1279_v38  ;;  %v1316_v38 = vld [vmem:[#allocation7 + $0x1a0] ss:$8 sps:$4 sm:$0xff]  }
  0x94   :  { %690 = vmatprep.subr.bf16.mxu0 %v1280_v39  ;;  %v1321_v39 = vld [vmem:[#allocation7 + $0x1b4] ss:$8 sps:$4 sm:$0xff]  }
  0x97   :  { %691 = vmatpush1.bf16.msra.mxu0 %v1282_v40  ;;  %v1319_v40 = vld [vmem:[#allocation7 + $0x1b0] ss:$8 sps:$4 sm:$0xff]  }
  0x98   :  { %692 = vmatprep.subr.bf16.mxu0 %v1283_v41  ;;  %v1324_v41 = vld [vmem:[#allocation7 + $0x1c4] ss:$8 sps:$4 sm:$0xff]  }
  0x9b   :  { %693 = vmatpush1.bf16.msra.mxu0 %v1285_v42  ;;  %v1322_v42 = vld [vmem:[#allocation7 + $0x1c0] ss:$8 sps:$4 sm:$0xff]  }
  0x9c   :  { %703 = vmatprep.subr.bf16.mxu0 %v1288_v43  ;;  %v122_v43 = vsub.s32 2, %v1638_v57  ;;  %v1353_v57 = vld [vmem:[#allocation10 + $0x18] sm:$0xff]  }
  0x9e   :  { %v123_v46 = vrot.slane %v1644_v59, %v122_v43  ;;  %v1349_v59 = vld [vmem:[#allocation8 + $0x38] sm:$0xff]  }
  0x9f   :  { %1169 = vmatpush3.bf16.msra.mxu1 %v1349_v59 }
 0x137   :  { %v210_v63 = vpop.f32.mrb[0].mxu1 }
 0x138   :  { %v211_v0 = vadd.f32 %v210_v63, %v115_v61  ;;  %v212_v1 = vpop.f32.mrb[1].mxu1  ;;  %v1510_v61 = vmov 0.0  }
 0x139   :  { %v213_v2 = vadd.f32 %v212_v1, %v119_v62  ;;  %v214_v3 = vpop.f32.mrb[2].mxu1  ;;  %1185 = vmatprep.subr.bf16.mxu1 %v1510_v61  ;;  %v330_v62 = vld [vmem:[%s1689_s4] sm:$0x3] }
 0x13a   :  { %v258_v5 = vmax.f32 %v211_v0, 0.0  ;;  %v215_v6 = vpop.f32.mrb[3].mxu1  ;;  %v335_v63 = vrot.slane %v330_v62, %v114_v58  ;;  %v339_v0 = vrot.slane %v330_v62, %v118_v60  ;;  %v1352_v58 = vld [vmem:[#allocation10 + $0x10] sm:$0xff]   ;;  %v1354_v60 = vld [vmem:[#allocation10 + $0x20] sm:$0xff]  }
 0x13b   :  { %v259_v7 = vmax.f32 %v213_v2, 0.0 }
 0x13c   :  { %v262_v11 = vpack.c.bf16 %v258_v5, %v258_v5 }
 0x13d   :  { %v263_v8 = vpack.c.bf16 %v259_v7, %v259_v7 }
 0x13f   :  { %694 = vmatprep.mubr.bf16.mxu0 %v263_v8  ;;  %v1655_v13 = vpop.f32.mrb[4].mxu1 }
 0x140   :  { %695 = vmatmul.mubr.bf16.vlgmr.msra.gmra.mrb[0].mxu0 %v262_v11  ;;  %v253_v14 = vpop.f32.mrb[5].mxu1  ;;  %v252_v49 = vadd.f32 %v1655_v13, %v123_v46  ;;  %v1355_v13 = vld [vmem:[#allocation10 + $0x28] sm:$0xff]  }
 0x141   :  { %704 = vmatpush1.bf16.msra.mxu0 %v1286_v9  ;;  %v254_v16 = vadd.f32 %v253_v14, %v127_v10  ;;  %v255_v17 = vpop.f32.mrb[6].mxu1  ;;  %v1350_v10 = vld [vmem:[#allocation10] sm:$0xff]   ;;  %v1356_v14 = vld [vmem:[#allocation10 + $0x30] sm:$0xff]  }
 0x142   :  { %705 = vmatprep.subr.bf16.mxu0 %v1291_v12  ;;  %v256_v19 = vpop.f32.mrb[7].mxu1  ;;  %v260_v52 = vmax.f32 %v252_v49, 0.0  ;;  %v1351_v12 = vld [vmem:[#allocation10 + $0x8] sm:$0xff]   ;;  %v1128_v17 = vld [vmem:[%s1691_s6] ss:$0 sm:$0xff]  ;;  %s1468_s6 = scalar_lea.vmem %s1044_s13, 128 }
 0x143   :  { %v261_v20 = vmax.f32 %v254_v16, 0.0  ;;  %p1469_p12 = scmp.ne.s32.totalorder %s1044_s13, %s1468_s6  ;;  %p1474_p0 = scmp.lt.s32.totalorder %s1468_s6, %s1468_s6 }
 0x144   :  { %v264_v53 = vpack.c.bf16 %v260_v52, %v260_v52 }
 0x145   :  { %706 = vmatpush1.bf16.msra.mxu0 %v1289_v15  ;;  %v265_v22 = vpack.c.bf16 %v261_v20, %v261_v20  ;;  %v1357_v15 = vld [vmem:[#allocation10 + $0x38] sm:$0xff]   ;;  %p1475_p1 = por %p1474_p0, %p1473_p13 }
 0x146   :  { %707 = vmatprep.subr.bf16.mxu0 %v1294_v18 }
 0x147   :  { %735 = vmatprep.mubr.bf16.mxu0 %v265_v22  ;;  %p1476_p2 = pnand %p1475_p1, %p1469_p12 }
 0x149   :  { %708 = vmatpush1.bf16.msra.mxu0 %v1292_v21 }
 0x14a   :  { %709 = vmatprep.subr.bf16.mxu0 %v1297_v23 }
 0x14d   :  { %710 = vmatpush1.bf16.msra.mxu0 %v1295_v24 }
 0x14e   :  { %711 = vmatprep.subr.bf16.mxu0 %v1300_v25  ;;  %v1145_v25 = vld [vmem:[%s1693_s8] ss:$0 sm:$0xff] }
 0x151   :  { %712 = vmatpush1.bf16.msra.mxu0 %v1298_v26 }
 0x152   :  { %713 = vmatprep.subr.bf16.mxu0 %v1303_v27 }
 0x155   :  { %714 = vmatpush1.bf16.msra.mxu0 %v1301_v28 }
 0x156   :  { %715 = vmatprep.subr.bf16.mxu0 %v1306_v29 }
 0x159   :  { %716 = vmatpush1.bf16.msra.mxu0 %v1304_v30 }
 0x15a   :  { %717 = vmatprep.subr.bf16.mxu0 %v1309_v31 }
 0x15d   :  { %718 = vmatpush1.bf16.msra.mxu0 %v1307_v32 }
 0x15e   :  { %719 = vmatprep.subr.bf16.mxu0 %v1312_v33 }
 0x161   :  { %720 = vmatpush1.bf16.msra.mxu0 %v1310_v34 }
 0x162   :  { %721 = vmatprep.subr.bf16.mxu0 %v1315_v35 }
 0x165   :  { %722 = vmatpush1.bf16.msra.mxu0 %v1313_v36 }
 0x166   :  { %723 = vmatprep.subr.bf16.mxu0 %v1318_v37 }
 0x169   :  { %724 = vmatpush1.bf16.msra.mxu0 %v1316_v38 }
 0x16a   :  { %725 = vmatprep.subr.bf16.mxu0 %v1321_v39 }
 0x16d   :  { %726 = vmatpush1.bf16.msra.mxu0 %v1319_v40 }
 0x16e   :  { %727 = vmatprep.subr.bf16.mxu0 %v1324_v41 }
 0x171   :  { %728 = vmatpush1.bf16.msra.mxu0 %v1322_v42 }
 0x172   :  { %729 = vmatprep.subr.bf16.mxu0 %v1327_v44 }
 0x175   :  { %730 = vmatpush1.bf16.msra.mxu0 %v1325_v45 }
 0x176   :  { %731 = vmatprep.subr.bf16.mxu0 %v1330_v47 }
 0x179   :  { %732 = vmatpush1.bf16.msra.mxu0 %v1328_v48 }
 0x17a   :  { %733 = vmatprep.subr.bf16.mxu0 %v1333_v50 }
 0x17d   :  { %734 = vmatpush1.bf16.msra.mxu0 %v1331_v51 }
 0x180   :  { %736 = vmatmul.mubr.bf16.vlgmr.msra.gmra.mrb[0].mxu0 %v264_v53 }
 0x253   :  { %v737_v1 = vpop.f32.mrb[0].mxu0 }
 0x254   :  { %v1205_v2 = vadd.f32 %v737_v1, %v335_v63  ;;  %v739_v3 = vpop.f32.mrb[1].mxu0 }
 0x255   :  { %v1206_v4 = vadd.f32 %v739_v3, %v339_v0  ;;  %v741_v5 = vpop.f32.mrb[2].mxu0 }
 0x256   :  { %v744_v6 = vmax.f32 %v1205_v2, 0.0  ;;  %v742_v7 = vpop.f32.mrb[3].mxu0 }
 0x257   :  { %v745_v8 = vmax.f32 %v1206_v4, 0.0 }
 0x258   :  { %v746_v11 = vpack.c.bf16 %v744_v6, %v744_v6 }
 0x259   :  { %v747_v9 = vpack.c.bf16 %v745_v8, %v745_v8 }
 0x25b   :  { %915 = vmatprep.mubr.bf16.mxu1 %v747_v9 }
 0x25c   :  { %916 = vmatmul.mubr.bf16.vlgmr.msra.gmra.mrb[8].mxu1 %v746_v11 }
 0x25d   :  { %1186 = vmatpush3.bf16.msra.mxu1 %v1350_v10  ;;  %1201 = vmatprep.mubr.msk.bf16.mxu1 %vm1511_vm1, %v1510_v61 }
 0x25e   :  { %1187 = vmatprep.subr.bf16.mxu1 %v1510_v61 }
 0x261   :  { %1188 = vmatpush3.bf16.msra.mxu1 %v1351_v12 }
 0x262   :  { %1189 = vmatprep.subr.bf16.mxu1 %v1510_v61 }
 0x265   :  { %1190 = vmatpush3.bf16.msra.mxu1 %v1352_v58 }
 0x266   :  { %1191 = vmatprep.subr.bf16.mxu1 %v1510_v61 }
 0x269   :  { %1192 = vmatpush3.bf16.msra.mxu1 %v1353_v57 }
 0x26a   :  { %1193 = vmatprep.subr.bf16.mxu1 %v1510_v61 }
 0x26d   :  { %1194 = vmatpush3.bf16.msra.mxu1 %v1354_v60 }
 0x26e   :  { %1195 = vmatprep.subr.bf16.mxu1 %v1510_v61 }
 0x271   :  { %1196 = vmatpush3.bf16.msra.mxu1 %v1355_v13 }
 0x272   :  { %1197 = vmatprep.subr.bf16.mxu1 %v1510_v61 }
 0x275   :  { %1198 = vmatpush3.bf16.msra.mxu1 %v1356_v14 }
 0x276   :  { %1199 = vmatprep.subr.bf16.mxu1 %v1510_v61 }
 0x279   :  { %1200 = vmatpush3.bf16.msra.mxu1 %v1357_v15 }
 0x32f   :  { %v1170_v16 = vpop.f32.mrb[8].mxu1 }
 0x330   :  { %v1171_v18 = vpop.f32.mrb[9].mxu1 }
 0x331   :  { %v1172_v19 = vadd.f32 %v1171_v18, %v1170_v16  ;;  %v1173_v20 = vpop.f32.mrb[10].mxu1 }
 0x332   :  { %v1174_v21 = vpop.f32.mrb[11].mxu1 }
 0x333   :  { %v918_v22 = vadd.f32 %v1172_v19, %v1128_v17 }
 0x335   :  { %v923_v23 = vmax.f32 %v918_v22, 0.0 }
 0x337   :  { %v924_v24 = vpack.c.bf16 %v923_v23, %v923_v23 }
 0x339   :  { %1202 = vmatmul.mubr.bf16.vlgmr.msra.gmra.mrb[12].mxu1 %v924_v24 }
 0x40c   :  { %v1030_v26 = vpop.f32.mrb[12].mxu1 }
 0x40d   :  { %v1031_v27 = vadd.f32 %v1145_v25, %v1030_v26  ;;  %v1203_v28 = vpop.f32.mrb[13].mxu1 }
 0x40e   :  { %v1033_v29 = vpop.f32.mrb[14].mxu1 }
 0x40f   :  { %1036 = vst [vmem:[#allocation11] sm:$0xff] %v1031_v27  ;;  %v1204_v30 = vpop.f32.mrb[15].mxu1 }
 0x410   :  { %1479 = shalt.err (!%p1476_p2)
}
 0x411   :  { %s1480_s8 = scalar_lea.hbm %s1694_s9, 128 }
 0x412   :  { %p1481_p3 = scmp.ne.s32.totalorder %s1694_s9, %s1480_s8  ;;  %p1484_p4 = scmp.lt.u32.totalorder %s1480_s8, %s1694_s9 }
 0x414   :  { %p1486_p5 = pnand %p1484_p4, %p1481_p3 }
 0x416   :  { %1489 = shalt.err (!%p1486_p5)
}
 0x417   :  { %1046 = dma.vmem_to_hbm [thread:$0]  %s1044_s13, 128, %s1694_s9, [#allocation4]  }
 0x418   :  { %1496 = dma.done.wait [#allocation4], 128  }
 0x419   :  { %1497 = vsyncadd [#allocation4], 4294967168 }
 0x41a   :  { %1050 = vsyncpa [#allocation3], 1 }
 0x41b   :  { %1051 = vsyncpa [#allocation6], 1 }
 0x41c   :  { %1052 = vsyncpa [#allocation9], 1 }
 0x41d   :  { %1053 = vsyncpa [#allocation4], 1 }

</bundles_post_ra>
